<compile_context>
chip_gen: v6e
topology: v6e:2x2x1
jax: 0.10.0
libtpu: 0.0.40
codegen_flags: <defaults>
</compile_context>

<pallas_src>
import jax
import jax.numpy as jnp
from jax.experimental import pallas as pl
from jax.experimental.pallas import tpu as pltpu


# ---------------------------------------------------------------------------
# Small-shape path: single invocation, whole arrays resident in VMEM.
# ---------------------------------------------------------------------------
def _small_linear_kernel(x_ref, w_ref, b_ref, o_ref):
    # Single full-width store of the whole output block (no per-row masked stores).
    o_ref[...] = (
        jnp.dot(x_ref[...], w_ref[...], preferred_element_type=jnp.float32)
        + b_ref[...]
    ).astype(o_ref.dtype)


def _small_identity_kernel(x_ref, o_ref):
    o_ref[...] = x_ref[...].astype(o_ref.dtype)


def _small_projection(x, w, b, out_dtype):
    B, H = x.shape[0], w.shape[1]
    vmem = pl.BlockSpec(memory_space=pltpu.MemorySpace.VMEM)
    return pl.pallas_call(
        _small_linear_kernel,
        out_shape=jax.ShapeDtypeStruct((B, H), out_dtype),
        in_specs=[vmem, vmem, vmem],
        out_specs=vmem,
    )(x, w, b)


def _small_identity(x, out_dtype):
    vmem = pl.BlockSpec(memory_space=pltpu.MemorySpace.VMEM)
    return pl.pallas_call(
        _small_identity_kernel,
        out_shape=jax.ShapeDtypeStruct(x.shape, out_dtype),
        in_specs=[vmem],
        out_specs=vmem,
    )(x)


# ---------------------------------------------------------------------------
# Production-shape path: grid-tiled projection matmul (bf16 MXU, f32 accumulate).
# ---------------------------------------------------------------------------
def _tiled_linear_kernel(x_ref, w_ref, b_ref, o_ref, acc_ref):
    k = pl.program_id(2)

    @pl.when(k == 0)
    def _():
        acc_ref[...] = jnp.zeros_like(acc_ref)

    acc_ref[...] += jnp.dot(x_ref[...], w_ref[...],
                            preferred_element_type=jnp.float32)

    @pl.when(k == pl.num_programs(2) - 1)
    def _():
        o_ref[...] = (acc_ref[...] + b_ref[...].astype(jnp.float32)).astype(o_ref.dtype)


def _tiled_projection(x, w, b, *, tm, tn, tk, out_dtype,
                      compute_dtype=jnp.bfloat16):
    M, K = x.shape
    N = w.shape[1]
    # bf16 MXU operands (all generations are bf16-native); halves weight/activation
    # DMA bytes.  Accumulation stays in f32 via preferred_element_type + scratch.
    x = x.astype(compute_dtype)
    w = w.astype(compute_dtype)
    grid = (M // tm, N // tn, K // tk)
    return pl.pallas_call(
        _tiled_linear_kernel,
        out_shape=jax.ShapeDtypeStruct((M, N), out_dtype),
        grid_spec=pltpu.PrefetchScalarGridSpec(
            num_scalar_prefetch=0,
            grid=grid,
            in_specs=[
                pl.BlockSpec((tm, tk), lambda i, j, k: (i, k)),
                pl.BlockSpec((tk, tn), lambda i, j, k: (k, j)),
                pl.BlockSpec((1, tn), lambda i, j, k: (0, j)),
            ],
            out_specs=pl.BlockSpec((tm, tn), lambda i, j, k: (i, j)),
            scratch_shapes=[pltpu.VMEM((tm, tn), jnp.float32)],
        ),
        compiler_params=pltpu.CompilerParams(
            # v7x has 2 TensorCores: output grid axes are independent -> parallel.
            dimension_semantics=("parallel", "parallel", "arbitrary"),
            # Tiles here are << 1 MiB; stay well inside v7x's scoped VMEM budget.
            vmem_limit_bytes=32 * 1024 * 1024,
        ),
    )(x, w, b)


# ---------------------------------------------------------------------------
# Public wrapper — mirrors CrossModalAttention.forward.
# ---------------------------------------------------------------------------
def cross_modal_attention(us_feat, wsi_feat, params, *,
                          tm=128, tn=128, tk=256, out_dtype=jnp.float32):
    B, us_dim = us_feat.shape
    wsi_dim = wsi_feat.shape[1]
    hidden = max(us_dim, wsi_dim)
    us_linear = us_dim != hidden        # nn.Linear vs nn.Identity, as in the module

    # attn == softmax over a size-1 axis == 1.0, so the wsi projection, the q/k
    # linears and the softmax are numerically inert: nothing from the wsi branch
    # is passed to (or DMA'd by) any kernel.
    if us_linear:
        w = params["Wus"]
        b = params["bus"].reshape(1, hidden)
        if (B % tm == 0) and (hidden % tn == 0) and (us_dim % tk == 0):
            us_p = _tiled_projection(us_feat, w, b,
                                     tm=tm, tn=tn, tk=tk, out_dtype=out_dtype)
        else:
            us_p = _small_projection(us_feat, w, b, out_dtype)
    else:
        us_p = _small_identity(us_feat, out_dtype)

    # out[i, j, :] = us_p[j, :]: pure broadcast along axis 0.  Left to the wrapper
    # (and fusable by the consumer) instead of O(B^2*H) kernel writeback.
    return jnp.broadcast_to(us_p[None, :, :], (B, B, hidden))


# ---------------------------------------------------------------------------
# Pure-JAX replica of the FULL PyTorch forward (incl. the q/k/softmax path).
# ---------------------------------------------------------------------------
def reference(us_feat, wsi_feat, p):
    us_dim, wsi_dim = us_feat.shape[1], wsi_feat.shape[1]
    hidden = max(us_dim, wsi_dim)
    us_p = us_feat @ p["Wus"] + p["bus"] if us_dim != hidden else us_feat
    wsi_p = wsi_feat @ p["Wwsi"] + p["bwsi"] if wsi_dim != hidden else wsi_feat
    q = (us_p @ p["Wq"] + p["bq"])[:, None, :]           # [B, 1, H]
    k = (wsi_p @ p["Wk"] + p["bk"])[:, :, None]          # [B, H, 1]
    attn = jax.nn.softmax(jnp.matmul(q, k), axis=-1)     # [B, 1, 1] (== 1.0)
    return attn * us_p + (1.0 - attn) * wsi_p            # broadcasts to [B, B, H]


def init_params(key, us_dim, wsi_dim):
    hidden = max(us_dim, wsi_dim)
    ks = jax.random.split(key, 4)

    def lin(k, din, dout):
        kw, kb = jax.random.split(k)
        # PyTorch Linear stores W as [out, in]; keep [in, out] so x @ W works.
        w = (jax.random.normal(kw, (dout, din), jnp.float32) * 0.1).T
        b = jax.random.normal(kb, (dout,), jnp.float32) * 0.1
        return w, b

    p = {}
    if us_dim != hidden:                      # else nn.Identity: no parameters
        p["Wus"], p["bus"] = lin(ks[0], us_dim, hidden)
    if wsi_dim != hidden:
        p["Wwsi"], p["bwsi"] = lin(ks[1], wsi_dim, hidden)
    # query/key linears: consumed by the faithful reference only (numerically inert).
    p["Wq"], p["bq"] = lin(ks[2], hidden, hidden)
    p["Wk"], p["bk"] = lin(ks[3], hidden, hidden)
    return p


if __name__ == "__main__":
    key = jax.random.PRNGKey(0)
    k_us, k_wsi, k_p, k_rest = jax.random.split(key, 4)

    # ---- small shape (single-invocation whole-array VMEM path) ----
    B, us_dim, wsi_dim = 4, 16, 32            # hidden_dim = max = 32
    us_feat = jax.random.normal(k_us, (B, us_dim), jnp.float32)
    wsi_feat = jax.random.normal(k_wsi, (B, wsi_dim), jnp.float32)
    params = init_params(k_p, us_dim, wsi_dim)

    out = jax.block_until_ready(cross_modal_attention(us_feat, wsi_feat, params))
    ref = jax.block_until_ready(reference(us_feat, wsi_feat, params))
    assert out.shape == (B, B, max(us_dim, wsi_dim)), out.shape
    assert jnp.allclose(out, ref, atol=1e-5, rtol=1e-5), "small-shape mismatch"

    # ---- aligned shape: exercises the tiled bf16 MXU projection path ----
    k_us2, k_wsi2, k_p2 = jax.random.split(k_rest, 3)
    B2, us_dim2, wsi_dim2 = 128, 256, 384     # hidden = 384; tiles (128, 128, 256)
    us_feat2 = jax.random.normal(k_us2, (B2, us_dim2), jnp.float32)
    wsi_feat2 = jax.random.normal(k_wsi2, (B2, wsi_dim2), jnp.float32)
    params2 = init_params(k_p2, us_dim2, wsi_dim2)

    out2 = jax.block_until_ready(cross_modal_attention(us_feat2, wsi_feat2, params2))
    ref2 = jax.block_until_ready(reference(us_feat2, wsi_feat2, params2))
    assert out2.shape == (B2, B2, wsi_dim2), out2.shape
    # bf16 MXU operands vs f32 reference -> loose tolerance.
    assert jnp.allclose(out2, ref2, atol=5e-2, rtol=5e-2), "tiled-shape mismatch"

    print("KERNEL_OK")
</pallas_src>

<mosaic_0001>
module attributes {stable_mosaic.version = 11 : i64} {
  func.func @_small_linear_kernel(%arg0: memref<4x16xf32, #tpu.memory_space<vmem>>, %arg1: memref<16x32xf32, #tpu.memory_space<vmem>>, %arg2: memref<1x32xf32, #tpu.memory_space<vmem>>, %arg3: memref<4x32xf32, #tpu.memory_space<vmem>>) attributes {dimension_semantics = [], scalar_prefetch = 0 : i64, scratch_operands = 0 : i64, tpu.core_type = #tpu.core_type<tc>} {
    %c0 = arith.constant 0 : index
    %c0_0 = arith.constant 0 : index
    %0 = vector.load %arg0[%c0, %c0_0] : memref<4x16xf32, #tpu.memory_space<vmem>>, vector<4x16xf32>
    %c0_1 = arith.constant 0 : index
    %c0_2 = arith.constant 0 : index
    %1 = vector.load %arg1[%c0_1, %c0_2] : memref<16x32xf32, #tpu.memory_space<vmem>>, vector<16x32xf32>
    %cst = arith.constant dense<0.000000e+00> : vector<4x32xf32>
    %2 = tpu.matmul %0, %1, %cst {dimension_numbers = #tpu.dot_dimension_numbers<[1], [0], [0], [1], [0, 0, 1, 1], [], []>} : vector<4x16xf32>, vector<16x32xf32>, vector<4x32xf32> -> vector<4x32xf32>
    %c0_3 = arith.constant 0 : index
    %c0_4 = arith.constant 0 : index
    %3 = vector.load %arg2[%c0_3, %c0_4] : memref<1x32xf32, #tpu.memory_space<vmem>>, vector<1x32xf32>
    %4 = vector.broadcast %3 : vector<1x32xf32> to vector<4x32xf32>
    %5 = arith.addf %2, %4 : vector<4x32xf32>
    %c0_5 = arith.constant 0 : index
    %c0_6 = arith.constant 0 : index
    %6 = vector.load %arg3[%c0_5, %c0_6] : memref<4x32xf32, #tpu.memory_space<vmem>>, vector<4x32xf32>
    tpu.vector_store %arg3[%c0_5, %c0_6], %5 {strides = array<i32>} : memref<4x32xf32, #tpu.memory_space<vmem>>, vector<4x32xf32>,
    return
  }
}

</mosaic_0001>

<bundles_post_ra>
// kernel: tpu_custom_call.1
= control target key start
LH: loop header
LB: loop body
LE: loop exit
PB: predicated region body
PF: predicated region fallthrough
CT: control target
= control target key end

     0   :  { %8 = vsyncpa [#allocation3], 0  ;;  %s267_s0 = inlined_call_operand.hbm [shape: f32[4,16], index: 0, kind: input, shape index: {}]   ;;  %s268_s1 = inlined_call_operand.hbm [shape: f32[16,32], index: 1, kind: input, shape index: {}]   ;;  %s269_s2 = inlined_call_operand.vmem [shape: f32[1,32], index: 2, kind: input, shape index: {}]   ;;  %s270_s3 = inlined_call_operand.hbm [shape: f32[4,32], index: 3, kind: output, shape index: {}]  }
   0x1   :  { %9 = vsyncpa [#allocation6], 0 }
   0x2   :  { %10 = vsyncpa [#allocation4], 0  ;;  %s228_s12 = smov [#allocation2]   ;;  %s229_s14 = smov [#allocation5]  }
   0x3   :  { %s17_s13 = sshll.u32 %s228_s12, 4  ;;  %s26_s15 = sshll.u32 %s229_s14, 4  ;;  %s18_s13 = int_to_ptr.vmem [resolvable:$true] %s17_s13  ;;  %s27_s15 = int_to_ptr.vmem [resolvable:$true] %s26_s15 }
   0x4   :  { %s170_s16 = scalar_lea.vmem %s18_s13, 64  ;;  %p175_p1 = scmp.lt.s32.totalorder %s18_s13, %s18_s13 }
   0x5   :  { %p171_p0 = scmp.ne.s32.totalorder %s18_s13, %s170_s16  ;;  %p176_p2 = scmp.lt.s32.totalorder %s170_s16, %s170_s16 }
   0x7   :  { %p177_p3 = por %p176_p2, %p175_p1 }
   0x9   :  { %p178_p4 = pnand %p177_p3, %p171_p0 }
   0xb   :  { %181 = shalt.err (!%p178_p4)
}
   0xc   :  { %20 = dma.hbm_to_vmem [thread:$0]  %s267_s0, 64, %s18_s13, [#allocation3]  }
   0xd   :  { %s190_s19 = scalar_lea.vmem %s27_s15, 256  ;;  %p195_p6 = scmp.lt.s32.totalorder %s27_s15, %s27_s15 }
   0xe   :  { %p191_p5 = scmp.ne.s32.totalorder %s27_s15, %s190_s19  ;;  %p196_p7 = scmp.lt.s32.totalorder %s190_s19, %s190_s19 }
  0x10   :  { %p197_p8 = por %p196_p7, %p195_p6 }
  0x12   :  { %p198_p9 = pnand %p197_p8, %p191_p5 }
  0x14   :  { %201 = shalt.err (!%p198_p9)
}
  0x15   :  { %s230_s20 = smov 128   ;;  %s231_s21 = smov 8  }
  0x16   :  { %32 = dma.hbm_to_vmem [thread:$0]  %s268_s1, 256, %s27_s15, [#allocation6], %s230_s20, %s230_s20, %s231_s21  }
  0x17   :  { %222 = dma.done.wait [#allocation3], 64  }
  0x18   :  { %223 = vsyncadd [#allocation3], 4294967232 }
  0x19   :  { %224 = dma.done.wait [#allocation6], 256  }
  0x1a   :  { %225 = vsyncadd [#allocation6], 4294967040  ;;  %v232_v0 = vmov 0.0   ;;  %vm233_vm0 = vmmov 0   ;;  %v43_v1 = vld [vmem:[#allocation5 + $0x8] sm:$0xff]  ;;  %v42_v2 = vld [vmem:[#allocation5] sm:$0xff] }
  0x1b   :  { %148 = vmatprep.subr.mxu0 %v232_v0  ;;  %152 = vmatprep.mubr.msk.f32.mxu0 %vm233_vm0, %v232_v0  ;;  %v41_v3 = vld [vmem:[#allocation2] sm:$0xf]  ;;  %vm51_vm1 = vcmask 130048   ;;  %s234_s1 = smov [#allocation7]   ;;  %vm125_vm2 = vcmask 257024  }
  0x1c   :  { %149 = vmatpush3.msra.mxu0 %v43_v1  ;;  %v143_v4 = vld [vmem:[%s269_s2] ss:$0 sm:$0xff]  ;;  %s133_s25 = sshll.u32 %s234_s1, 4  ;;  %s134_s25 = int_to_ptr.vmem [resolvable:$true] %s133_s25 }
  0x1d   :  { %150 = vmatprep.subr.mxu0 %v232_v0  ;;  %s202_s26 = scalar_lea.vmem %s134_s25, 64  ;;  %p207_p11 = scmp.lt.s32.totalorder %s134_s25, %s134_s25 }
  0x1e   :  { %151 = vmatpush3.msra.mxu0 %v42_v2  ;;  %p203_p10 = scmp.ne.s32.totalorder %s134_s25, %s202_s26  ;;  %p208_p12 = scmp.lt.s32.totalorder %s202_s26, %s202_s26 }
  0x1f   :  { %153 = vmatmul.mubr.msk.f32.vlgmr.msra.gmra.mxu0 %vm51_vm1, %v41_v3 }
  0x20   :  { %p209_p13 = por %p208_p12, %p207_p11 }
  0x22   :  { %p210_p0 = pnand %p209_p13, %p203_p10 }
  0xdf   :  { %v121_v5 = vpop.f32.mrf.mxu0 }
  0xe0   :  { %v122_v6 = vadd.f32 %v143_v4, %v121_v5 }
  0xe1   :  { %v154_v7 = vpop.f32.mrf.mxu0 }
  0xe2   :  { %126 = vst.msk [vmem:[#allocation7] sm:$0xf] %vm125_vm2, %v122_v6 }
  0xe3   :  { %213 = shalt.err (!%p210_p0)
}
  0xe4   :  { %136 = dma.vmem_to_hbm [thread:$0]  %s134_s25, 64, %s270_s3, [#allocation4]  }
  0xe5   :  { %226 = dma.done.wait [#allocation4], 64  }
  0xe6   :  { %227 = vsyncadd [#allocation4], 4294967232 }
  0xe7   :  { %140 = vsyncpa [#allocation3], 1 }
  0xe8   :  { %141 = vsyncpa [#allocation6], 1 }
  0xe9   :  { %142 = vsyncpa [#allocation4], 1 }

</bundles_post_ra>
